<compile_context>
chip_gen: v5e
topology: v5e:2x2
jax: 0.10.0
libtpu: 0.0.40
codegen_flags: <defaults>
</compile_context>

<pallas_src>
import functools

import jax
import jax.numpy as jnp
from jax import lax
from jax.experimental import pallas as pl
from jax.experimental.pallas import tpu as pltpu


def _fold_kernel(w_ref, b_ref, x_ref, o_ref, acc_ref, *, precision):
    """One grid step: acc += W_k @ x_k; on last k: out = acc + bias.

    w_ref:   (C_out, KT)    weight slice for this K step
    b_ref:   (C_out, 1)     resident bias (constant index_map)
    x_ref:   (1, KT, TN)    one batch, KT input channels, TN pixels (lane-dense)
    o_ref:   (1, C_out, TN) same pixels, reduced channels (lane-dense)
    acc_ref: (C_out, TN)    f32 VMEM accumulator, persists across the K axis
    """
    k = pl.program_id(2)

    @pl.when(k == 0)
    def _():
        acc_ref[...] = jnp.zeros_like(acc_ref)

    acc_ref[...] += jnp.dot(
        w_ref[...], x_ref[0],
        precision=precision,
        preferred_element_type=jnp.float32)                     # (C_out, TN)

    @pl.when(k == pl.num_programs(2) - 1)
    def _():
        o_ref[0] = (acc_ref[...] + b_ref[...].astype(jnp.float32)
                    ).astype(o_ref.dtype)


def _vmem_limit_bytes():
    """Generation-aware scoped-VMEM limit: 48 MiB on v7x, 64 MiB on v5e/v6e."""
    cap = 64 * 1024 * 1024          # conservative fallback (v7x physical VMEM)
    try:
        cap = int(pltpu.get_tpu_info().vmem_capacity_bytes)
    except Exception:
        pass
    return min((cap * 3) // 4, 64 * 1024 * 1024)


def _pick_k_tile(c_in, c_out, itemsize, weight_budget_bytes=8 << 20):
    """K-axis tile: whole C_in if the weight block fits ~8 MiB, else the
    largest multiple-of-128 divisor of C_in that fits (no ragged K blocks on a
    reduction axis)."""
    if c_out * c_in * itemsize <= weight_budget_bytes or c_in % 128 != 0:
        return c_in
    kt = 128
    for cand in range(128, c_in, 128):
        if c_in % cand == 0 and c_out * cand * itemsize <= weight_budget_bytes:
            kt = cand
    return kt


def _pick_spatial_tile(hw, bytes_per_pixel, tile_budget_bytes, min_spatial_tiles):
    """Largest multiple-of-128 tile within the VMEM budget; ragged last block
    handled by cdiv tiling.  Optionally shrink so the spatial axis has at
    least `min_spatial_tiles` grid steps (v7x megacore utilization)."""
    if hw <= 128:
        return hw                                   # full plane (== array dim)
    cap = max(128, (tile_budget_bytes // bytes_per_pixel) // 128 * 128)
    tn = min(cap, (hw // 128) * 128)                # never exceed the plane
    if min_spatial_tiles > 1:
        per_tile = -(-hw // min_spatial_tiles)      # ceil
        per_tile = ((per_tile + 127) // 128) * 128
        tn = min(tn, max(128, per_tile))
    return tn


def fold(x, weight, bias):
    """Fold: (B, C, H, W) -> (B, C//2, H, W) via a 1x1 conv channel reduction.

    weight: (C_out, C_in) = (C//2, C)  (squeezed Conv2d 1x1 kernel)
    bias:   (C_out,)
    """
    B, C, H, W = x.shape
    C_out, C_in = weight.shape
    assert C_in == C and C_out == C // 2, (weight.shape, x.shape)

    itemsize = x.dtype.itemsize
    hw = H * W
    x2 = x.reshape(B, C_in, hw)                    # lane-dense trailing axis
    bias2 = bias.reshape(C_out, 1)

    vmem_limit = _vmem_limit_bytes()
    kt = _pick_k_tile(C_in, C_out, weight.dtype.itemsize)
    num_k = C_in // kt

    # Per-pixel VMEM cost: double-buffered x + out blocks plus the f32 acc.
    bytes_per_pixel = 2 * kt * itemsize + 2 * C_out * itemsize + 4 * C_out
    weight_resident = 2 * (C_out * kt + C_out) * weight.dtype.itemsize
    if num_k == 1:
        # K axis untiled: the (double-buffered) resident weight must fit.
        assert weight_resident <= vmem_limit // 2, (
            "embed_dim too large for an untiled K axis on this chip; "
            "C_in must be a multiple of 128 to enable K tiling")
    tile_budget = max(128 * bytes_per_pixel, vmem_limit // 2 - weight_resident)

    min_spatial_tiles = 4 if B == 1 else 1         # keep both v7x TCs busy
    tn = _pick_spatial_tile(hw, bytes_per_pixel, tile_budget, min_spatial_tiles)
    num_s = pl.cdiv(hw, tn)
    grid = (B, num_s, num_k)

    precision = (lax.Precision.HIGHEST
                 if x.dtype == jnp.float32 else lax.Precision.DEFAULT)

    cost = pl.CostEstimate(
        flops=2 * B * hw * C_in * C_out,
        transcendentals=0,
        bytes_accessed=(B * hw * (C_in + C_out) + C_in * C_out + C_out) * itemsize)

    out = pl.pallas_call(
        functools.partial(_fold_kernel, precision=precision),
        out_shape=jax.ShapeDtypeStruct((B, C_out, hw), x.dtype),
        grid_spec=pltpu.PrefetchScalarGridSpec(
            num_scalar_prefetch=0,
            grid=grid,
            in_specs=[
                pl.BlockSpec((C_out, kt), lambda b, s, k: (0, k)),   # weight
                pl.BlockSpec((C_out, 1),  lambda b, s, k: (0, 0)),   # bias (resident)
                pl.BlockSpec((1, kt, tn), lambda b, s, k: (b, k, s)),
            ],
            out_specs=pl.BlockSpec((1, C_out, tn), lambda b, s, k: (b, 0, s)),
            scratch_shapes=[pltpu.VMEM((C_out, tn), jnp.float32)],
        ),
        compiler_params=pltpu.CompilerParams(
            dimension_semantics=("parallel", "parallel", "arbitrary"),
            vmem_limit_bytes=vmem_limit),
        cost_estimate=cost,
    )(weight, bias2, x2)

    return out.reshape(B, C_out, H, W)


def _reference_fold(x, weight, bias):
    """Plain-JAX reference (matches nn.Conv2d(embed_dim, embed_dim//2, 1))."""
    y = jnp.einsum("oc,bchw->bohw", weight, x,
                   precision=jax.lax.Precision.HIGHEST)
    return y + bias[None, :, None, None]


if __name__ == "__main__":
    key = jax.random.PRNGKey(0)
    kx, kw, kb = jax.random.split(key, 3)

    B, C, H, W = 2, 32, 16, 16                     # embed_dim = 32
    x = jax.random.normal(kx, (B, C, H, W), dtype=jnp.float32)
    weight = jax.random.normal(kw, (C // 2, C), dtype=jnp.float32) / jnp.sqrt(
        jnp.float32(C))
    bias = jax.random.normal(kb, (C // 2,), dtype=jnp.float32)

    out = jax.block_until_ready(fold(x, weight, bias))
    ref = _reference_fold(x, weight, bias)
    assert out.shape == (B, C // 2, H, W), out.shape
    assert jnp.allclose(out, ref, atol=1e-4, rtol=1e-4), "mismatch vs reference"

    # Ragged (non-128-multiple) spatial plane with batch 1: exercises the
    # cdiv masked-last-block path and the B==1 multi-tile spatial split.
    x_ragged = jax.random.normal(kx, (1, C, 16, 17), dtype=jnp.float32)
    out_ragged = jax.block_until_ready(fold(x_ragged, weight, bias))
    ref_ragged = _reference_fold(x_ragged, weight, bias)
    assert out_ragged.shape == (1, C // 2, 16, 17), out_ragged.shape
    assert jnp.allclose(out_ragged, ref_ragged, atol=1e-4, rtol=1e-4), (
        "ragged-tile mismatch vs reference")

    print("KERNEL_OK")
</pallas_src>

<mosaic_0001>
module attributes {stable_mosaic.version = 11 : i64} {
  func.func @_fold_kernel(%arg0: i32, %arg1: i32, %arg2: i32, %arg3: memref<16x32xf32, #tpu.memory_space<vmem>>, %arg4: memref<16x1xf32, #tpu.memory_space<vmem>>, %arg5: memref<1x32x256xf32, #tpu.memory_space<vmem>>, %arg6: memref<1x16x256xf32, #tpu.memory_space<vmem>>, %arg7: memref<16x256xf32, #tpu.memory_space<vmem>>) attributes {dimension_semantics = [#tpu.dimension_semantics<parallel>, #tpu.dimension_semantics<parallel>, #tpu.dimension_semantics<arbitrary>], iteration_bounds = array<i64: 2, 1, 1>, scalar_prefetch = 0 : i64, scratch_operands = 1 : i64, tpu.core_type = #tpu.core_type<tc>, window_params = [{transform_indices = @transform_0, window_bounds = array<i64: 16, 32>}, {pipeline_mode = #tpu.pipeline_mode<synchronous>, transform_indices = @transform_1, window_bounds = array<i64: 16, 1>}, {transform_indices = @transform_2, window_bounds = array<i64: 1, 32, 256>}, {transform_indices = @transform_3, window_bounds = array<i64: 1, 16, 256>}]} {
    %c0_i32 = arith.constant 0 : i32
    %0 = arith.cmpi eq, %arg2, %c0_i32 : i32
    %1 = arith.extui %0 : i1 to i32
    %c0_i32_0 = arith.constant 0 : i32
    %2 = arith.cmpi ne, %1, %c0_i32_0 : i32
    scf.if %2 {
      %cst_11 = arith.constant 0.000000e+00 : f32
      %13 = vector.broadcast %cst_11 : f32 to vector<16x256xf32>
      %c0_12 = arith.constant 0 : index
      %c0_13 = arith.constant 0 : index
      %14 = vector.load %arg7[%c0_12, %c0_13] : memref<16x256xf32, #tpu.memory_space<vmem>>, vector<16x256xf32>
      tpu.vector_store %arg7[%c0_12, %c0_13], %13 {strides = array<i32>} : memref<16x256xf32, #tpu.memory_space<vmem>>, vector<16x256xf32>,
    } else {
    }
    %c0 = arith.constant 0 : index
    %c0_1 = arith.constant 0 : index
    %3 = vector.load %arg7[%c0, %c0_1] : memref<16x256xf32, #tpu.memory_space<vmem>>, vector<16x256xf32>
    %c0_2 = arith.constant 0 : index
    %c0_3 = arith.constant 0 : index
    %4 = vector.load %arg3[%c0_2, %c0_3] : memref<16x32xf32, #tpu.memory_space<vmem>>, vector<16x32xf32>
    %c0_4 = arith.constant 0 : index
    %c0_5 = arith.constant 0 : index
    %c0_6 = arith.constant 0 : index
    %5 = vector.load %arg5[%c0_4, %c0_5, %c0_6] : memref<1x32x256xf32, #tpu.memory_space<vmem>>, vector<1x32x256xf32>
    %6 = vector.shape_cast %5 : vector<1x32x256xf32> to vector<32x256xf32>
    %cst = arith.constant dense<0.000000e+00> : vector<16x256xf32>
    %7 = tpu.matmul %4, %6, %cst {dimension_numbers = #tpu.dot_dimension_numbers<[1], [0], [0], [1], [0, 0, 1, 1], [], []>, precision = #tpu.contract_precision<fp32>} : vector<16x32xf32>, vector<32x256xf32>, vector<16x256xf32> -> vector<16x256xf32>
    %8 = arith.addf %3, %7 : vector<16x256xf32>
    %c0_7 = arith.constant 0 : index
    %c0_8 = arith.constant 0 : index
    %9 = vector.load %arg7[%c0_7, %c0_8] : memref<16x256xf32, #tpu.memory_space<vmem>>, vector<16x256xf32>
    tpu.vector_store %arg7[%c0_7, %c0_8], %8 {strides = array<i32>} : memref<16x256xf32, #tpu.memory_space<vmem>>, vector<16x256xf32>,
    %c0_i32_9 = arith.constant 0 : i32
    %10 = arith.cmpi eq, %arg2, %c0_i32_9 : i32
    %11 = arith.extui %10 : i1 to i32
    %c0_i32_10 = arith.constant 0 : i32
    %12 = arith.cmpi ne, %11, %c0_i32_10 : i32
    scf.if %12 {
      %c0_11 = arith.constant 0 : index
      %c0_12 = arith.constant 0 : index
      %13 = vector.load %arg7[%c0_11, %c0_12] : memref<16x256xf32, #tpu.memory_space<vmem>>, vector<16x256xf32>
      %c0_13 = arith.constant 0 : index
      %c0_14 = arith.constant 0 : index
      %14 = vector.load %arg4[%c0_13, %c0_14] : memref<16x1xf32, #tpu.memory_space<vmem>>, vector<16x1xf32>
      %15 = vector.broadcast %14 : vector<16x1xf32> to vector<16x256xf32>
      %16 = arith.addf %13, %15 : vector<16x256xf32>
      %c0_15 = arith.constant 0 : index
      %c0_16 = arith.constant 0 : index
      %c0_17 = arith.constant 0 : index
      %17 = vector.load %arg6[%c0_15, %c0_16, %c0_17] : memref<1x16x256xf32, #tpu.memory_space<vmem>>, vector<1x16x256xf32>
      %18 = vector.shape_cast %17 : vector<1x16x256xf32> to vector<16x256xf32>
      %19 = vector.shape_cast %16 : vector<16x256xf32> to vector<1x16x256xf32>
      tpu.vector_store %arg6[%c0_15, %c0_16, %c0_17], %19 {strides = array<i32>} : memref<1x16x256xf32, #tpu.memory_space<vmem>>, vector<1x16x256xf32>,
    } else {
    }
    return
  }
  func.func @transform_0(%arg0: i32, %arg1: i32, %arg2: i32) -> (i32, i32) {
    %c0_i32 = arith.constant 0 : i32
    %c0_i32_0 = arith.constant 0 : i32
    return %c0_i32, %arg2 : i32, i32
  }
  func.func @transform_1(%arg0: i32, %arg1: i32, %arg2: i32) -> (i32, i32) {
    %c0_i32 = arith.constant 0 : i32
    %c0_i32_0 = arith.constant 0 : i32
    %c0_i32_1 = arith.constant 0 : i32
    return %c0_i32, %c0_i32_0 : i32, i32
  }
  func.func @transform_2(%arg0: i32, %arg1: i32, %arg2: i32) -> (i32, i32, i32) {
    %c0_i32 = arith.constant 0 : i32
    return %arg0, %arg2, %arg1 : i32, i32, i32
  }
  func.func @transform_3(%arg0: i32, %arg1: i32, %arg2: i32) -> (i32, i32, i32) {
    %c0_i32 = arith.constant 0 : i32
    %c0_i32_0 = arith.constant 0 : i32
    return %arg0, %c0_i32, %arg1 : i32, i32, i32
  }
}

</mosaic_0001>

<bundles_post_ra>
// kernel: tpu_custom_call.1
= control target key start
LH: loop header
LB: loop body
LE: loop exit
PB: predicated region body
PF: predicated region fallthrough
CT: control target
= control target key end

     0   :  { %8 = vsyncpa [#allocation4], 0  ;;  %s1339_s0 = inlined_call_operand.vmem [shape: f32[16,32], index: 0, kind: input, shape index: {}]   ;;  %s1340_s1 = inlined_call_operand.vmem [shape: f32[16,1], index: 1, kind: input, shape index: {}]   ;;  %s1341_s2 = inlined_call_operand.hbm [shape: f32[2,32,256], index: 2, kind: input, shape index: {}]   ;;  %s1342_s3 = inlined_call_operand.hbm [shape: f32[2,16,256], index: 3, kind: output, shape index: {}]  }
   0x1   :  { %10 = vsyncpa [#allocation4 + $0x1], 0 }
   0x2   :  { %11 = vsyncpa [#allocation5], 0 }
   0x3   :  { %13 = vsyncpa [#allocation5 + $0x1], 0  ;;  %s1087_s12 = smov 0   ;;  %s1089_s13 = smov 0  }
   0x4   :  { %s1091_s14 = smov 0   ;;  %s1093_s15 = smov 0  }
   0x5   :  { %s1095_s16 = smov 0   ;;  %s1097_s17 = smov 0  }
   0x6 LB: > { %s862_s18 = sadd.s32 4294967295, %s1060_s17   ;;  %s863_s19 = sadd.s32 4294967294, %s1060_s17   ;;  %s1060_s17 = sphi %s1097_s17, %s19_s17   ;;  %s1056_s16 = sphi %s1095_s16, %s1351_s16   ;;  %s1052_s15 = sphi %s1093_s15, %s1350_s15   ;;  %s1048_s14 = sphi %s1091_s14, %s1349_s14   ;;  %s1044_s13 = sphi %s1089_s13, %s1348_s13   ;;  %s1040_s12 = sphi %s1087_s12, %s1347_s12  }
   0x7   : > { %s38_s20 = sadd.s32 1, %s1056_s16  ;;  %s96_s21 = sadd.s32 1, %s1048_s14 }
   0x8   : > { %p40_p0 = scmp.ge.s32.totalorder %s38_s20, 2  ;;  %p103_p1 = scmp.ne.s32.totalorder %s1048_s14, %s1044_s13 }
   0x9   : > { %p104_p2 = scmp.eq.s32.totalorder %s1060_s17, 0  ;;  %p109_p3 = scmp.ne.s32.totalorder %s1044_s13, %s1040_s12 }
   0xa   : > { %s1353_s20 = smov (%p40_p0, %s38_s20), 0  ;;  %p110_p5 = scmp.eq.s32.totalorder %s862_s18, 0 }
   0xb   : > { %p1128_p4 = por %p104_p2, %p103_p1  ;;  %s89_s23 = ssub.s32 %s1056_s16, %s1353_s20 }
   0xc   : > { %p135_p6 = scmp.eq.s32.totalorder %s862_s18, 1  ;;  %p94_p7 = scmp.eq.s32.totalorder %s89_s23, 0 }
   0xd   : > { %p1134_p8 = por %p110_p5, %p109_p3  ;;  %p141_p10 = scmp.eq.s32.totalorder %s863_s19, 1 }
   0xe   : > { %p1138_p9 = por %p135_p6, %p103_p1  ;;  %p866_p12 = scmp.ge.s32.totalorder %s1060_s17, 2 }
   0xf   : > { %s1143_s26 = scalar_select %p94_p7, %s1048_s14, %s96_s21  }
  0x10   : > { %p1145_p11 = por %p141_p10, %p109_p3  ;;  %p892_p13 = scmp.lt.s32.totalorder %s1060_s17, 2 }
  0x11   : > { %s171_s28 = sand.u32 1, %s1048_s14   ;;  %s878_s30 = sshll.u32 %s1056_s16, 6 }
  0x12   : > { %s867_s29 = sshll.u32 %s171_s28, 6  ;;  %s185_s6 = scalar_lea.hbm %s1341_s2, %s878_s30 }
  0x13   : > { %s175_s7 = scalar_lea.vmem [#allocation3], %s867_s29  ;;  %s186_s9 = sshll.u32 %s185_s6, 4  ;;  %s187_s9 = int_to_ptr.hbm [resolvable:$true] %s186_s9 }
  0x14   : > { %s188_s8 = sshll.u32 %s175_s7, 4  ;;  %p885_p0 = pnand %p892_p13, %p1128_p4  ;;  %s189_s8 = int_to_ptr.vmem [resolvable:$true] %s188_s8 }
  0x15   : > { %p870_p1 = scmp.ge.s32.totalorder %s1060_s17, 1  ;;  %s172_s10 = scalar_lea.sflag [#allocation4], %s171_s28 }
  0x16   : > { %s1062_s11 = smov 256   ;;  %s1063_s18 = smov 16  }
  0x17   : > { %887 = dma.hbm_to_vmem [thread:$0]  (!%p885_p0), %s187_s9, 1024, %s189_s8, %s172_s10, %s1062_s11, %s1062_s11, %s1063_s18  }
  0x18   : > { %p196_p2 = scmp.lt.s32.totalorder %s1060_s17, 3 }
  0x1a   : > { %p197_p3 = pnand %p870_p1, %p196_p2 }
  0x1b   : > { %s1161_s19 = sand.u32 (!%p197_p3), 1, %s1044_s13  }
  0x1c   : > { %200 = sbr.rel (%p197_p3) target bundleno = 230 (0xe6), region = 32  ;;  %s871_s21 = sshll.u32 (!%p197_p3), %s1161_s19, 6 }
  0x1d   : > { %s203_s23 = scalar_lea.sflag (!%p197_p3), [#allocation4], %s1161_s19  ;;  %s1165_s29 = scalar_lea.vmem (!%p197_p3), [#allocation3], %s871_s21 }
  0x21   : > { %1031 = dma.done.wait (%p1134_p8), %s203_s23, 1024  }
  0x22   : > { %1033 = vsyncadd (%p1134_p8), %s203_s23, 4294966272  ;;  %vm263_vm0 = vcmask 261120   ;;  %v261_v0 = vld [vmem:[%s1165_s29 + $0x30] sm:$0xff]  ;;  %v259_v1 = vld [vmem:[%s1165_s29 + $0x20] sm:$0xff]  ;;  %v1064_v63 = vmov 0   ;;  %s872_s8 = sshll.u32 %s1161_s19, 5 }
  0x23   : > { %v257_v2 = vld [vmem:[%s1165_s29 + $0x10] sm:$0xff]  ;;  %v1174_v3 = vand.u32 4294901760, %v261_v0  ;;  %v1176_v4 = vand.u32 4294901760, %v259_v1  ;;  %v255_v6 = vld [vmem:[%s1165_s29] sm:$0xff]  ;;  %v262_v8 = vld [vmem:[%s1165_s29 + $0x38] sm:$0xff]  ;;  %947 = vset.pattern.permute.xlu0 %v1064_v63  ;;  %s1294_s9 = scalar_lea.vmem [#allocation6], %s872_s8 }
  0x24   : > { %v1178_v5 = vand.u32 4294901760, %v257_v2  ;;  %v253_v7 = vld [vmem:[%s1339_s0] sm:$0xff]  ;;  %v1185_v9 = vand.u32 4294901760, %v255_v6  ;;  %v1188_v11 = vand.u32 4294901760, %v262_v8  ;;  %v260_v12 = vld [vmem:[%s1165_s29 + $0x28] sm:$0xff]  ;;  %v258_v37 = vld [vmem:[%s1165_s29 + $0x18] sm:$0xff] }
  0x25   : > { %v265_v10 = vsel %vm263_vm0, %v253_v7, 0  ;;  %v254_v13 = vld [vmem:[%s1339_s0 + $0x8] sm:$0xff]  ;;  %283 = vmatpush.msra.mxu0 %v1174_v3  ;;  %v320_v14 = vsub.f32 %v261_v0, %v1174_v3  ;;  %400 = vmatpush.msra.mxu3 %v1174_v3  ;;  %v326_v15 = vsub.f32 %v259_v1, %v1176_v4  ;;  %v1209_v20 = vand.u32 4294901760, %v260_v12  ;;  %v717_v62 = vld [vmem:[%s1340_s1] sm:$0xff]  ;;  %s879_s10 = sshll.u32 %s1052_s15, 5  ;;  %s752_s23 = sshll.u32 %s1294_s9, 4  ;;  %s753_s23 = int_to_ptr.vmem [resolvable:$true] %s752_s23 }
  0x26   : > { %v1199_v16 = vsub.f32 %v257_v2, %v1178_v5  ;;  %v1201_v17 = vand.u32 4294901760, %v265_v10  ;;  %v1204_v18 = vsub.f32 %v255_v6, %v1185_v9  ;;  %v1207_v19 = vsub.f32 %v262_v8, %v1188_v11  ;;  %v256_v38 = vld [vmem:[%s1165_s29 + $0x8] sm:$0xff]  ;;  %721 = vperm.xlu0 %947, %v717_v62   ;;  %s751_s21 = scalar_lea.hbm %s1342_s3, %s879_s10  ;;  %s738_s15 = scalar_lea.sflag [#allocation5], %s1161_s19 }
  0x27   : > { %v268_v21 = vsel %vm263_vm0, %v254_v13, 0  ;;  %285 = vmatpush.msra.mxu0 %v1176_v4  ;;  %366 = vmatpush.msra.mxu2 %v320_v14  ;;  %v321_v22 = vand.u32 4294901760, %v320_v14  ;;  %v327_v24 = vand.u32 4294901760, %v326_v15  ;;  %v1223_v29 = vsub.f32 %v260_v12, %v1209_v20  ;;  %v718_v0 = vld [vmem:[%s1340_s1 + $0x8] sm:$0xff]  ;;  %s754_s29 = sshll.u32 %s751_s21, 4  ;;  %s998_s4 = scalar_lea.hbm %s1342_s3, 64  ;;  %s755_s29 = int_to_ptr.hbm [resolvable:$true] %s754_s29 }
  0x28   : > { %v1214_v23 = vsub.f32 %v265_v10, %v1201_v17  ;;  %v333_v25 = vand.u32 4294901760, %v1199_v16  ;;  %402 = vmatpush.msra.mxu3 %v1176_v4  ;;  %v537_v26 = vand.u32 4294901760, %v1207_v19  ;;  %v339_v27 = vand.u32 4294901760, %v1204_v18  ;;  %s992_s22 = sshra.s32 %s755_s29, 4  ;;  %s993_s22 = int_to_ptr.hbm [resolvable:$true] %s992_s22 }
  0x29   : > { %v1220_v28 = vand.u32 4294901760, %v268_v21  ;;  %287 = vmatpush.msra.mxu0 %v1178_v5  ;;  %369 = vmatpush.msra.mxu2 %v326_v15  ;;  %v322_v30 = vsub.f32 %v320_v14, %v321_v22  ;;  %v328_v32 = vsub.f32 %v326_v15, %v327_v24  ;;  %v543_v36 = vand.u32 4294901760, %v1223_v29  ;;  %s994_s24 = scalar_lea.hbm %s993_s22, 32  ;;  %p999_p7 = scmp.lt.s32.totalorder %s993_s22, %s1342_s3 }
  0x2a   : > { %v1227_v31 = vand.u32 4294901760, %v1214_v23  ;;  %v334_v33 = vsub.f32 %v1199_v16, %v333_v25  ;;  %404 = vmatpush.msra.mxu3 %v1178_v5  ;;  %v538_v34 = vsub.f32 %v1207_v19, %v537_v26  ;;  %v340_v42 = vsub.f32 %v1204_v18, %v339_v27  ;;  %p995_p4 = scmp.ne.s32.totalorder %s993_s22, %s994_s24  ;;  %p1000_p8 = scmp.lt.s32.totalorder %s998_s4, %s994_s24 }
  0x2b   : > { %v1235_v35 = vsub.f32 %v268_v21, %v1220_v28  ;;  %289 = vmatpush.msra.mxu0 %v1185_v9  ;;  %v323_v39 = vand.u32 4294901760, %v322_v30  ;;  %372 = vmatpush.msra.mxu2 %v1199_v16  ;;  %v329_v41 = vand.u32 4294901760, %v328_v32  ;;  %v544_v45 = vsub.f32 %v1223_v29, %v543_v36 }
  0x2c   : > { %v293_v40 = vsub.f32 %v1214_v23, %v1227_v31  ;;  %406 = vmatpush.msra.mxu3 %v1185_v9  ;;  %v539_v43 = vand.u32 4294901760, %v538_v34  ;;  %v335_v47 = vand.u32 4294901760, %v334_v33  ;;  %v502_v48 = vand.u32 4294901760, %v258_v37  ;;  %p996_p5 = pnand %p995_p4, %p1138_p9  ;;  %p1001_p10 = por %p1000_p8, %p999_p7 }
  0x2d   : > { %435 = vmatpush.msrb.mxu0 %v321_v22  ;;  %v1247_v44 = vand.u32 4294901760, %v1235_v35  ;;  %324 = vmatpush.msra.mxu1 %v323_v39  ;;  %v504_v49 = vand.u32 4294901760, %v256_v38  ;;  %v545_v50 = vand.u32 4294901760, %v544_v45  ;;  %v341_v51 = vand.u32 4294901760, %v340_v42 }
  0x2e   : > { %v294_v46 = vand.u32 4294901760, %v293_v40  ;;  %375 = vmatpush.msra.mxu2 %v1204_v18  ;;  %410 = vmatmul.f32.vlgmr.msra.gmra.mxu3 %v1227_v31  ;;  %v548_v53 = vsub.f32 %v258_v37, %v502_v48  ;;  %p997_p6 = pneg %p996_p5 }
  0x2f   : > { %378 = vmatmul.f32.vlgmr.msra.gmra.mxu2 %v1214_v23  ;;  %330 = vmatpush.msra.mxu1 %v329_v41  ;;  %v301_v52 = vsub.f32 %v1235_v35, %v1247_v44  ;;  %v554_v54 = vsub.f32 %v256_v38, %v504_v49 }
  0x30   : > { %295 = vmatmul.f32.vlgmr.msra.gmra.mxu0 %v294_v46  ;;  %499 = vmatpush.msrb.mxu2 %v1188_v11  ;;  %v549_v55 = vand.u32 4294901760, %v548_v53  ;;  %p1002_p13 = pnand %p1001_p10, %p997_p6 }
  0x31   : > { %540 = vmatpush.msrb.mxu3 %v539_v43  ;;  %336 = vmatpush.msra.mxu1 %v335_v47  ;;  %v555_v56 = vand.u32 4294901760, %v554_v54  ;;  %v302_v57 = vand.u32 4294901760, %v301_v52 }
  0x32   : > { %439 = vmatpush.msrb.mxu0 %v327_v24  ;;  %501 = vmatpush.msrb.mxu2 %v1209_v20  ;;  %v550_v58 = vsub.f32 %v548_v53, %v549_v55 }
  0x33   : > { %546 = vmatpush.msrb.mxu3 %v545_v50  ;;  %342 = vmatpush.msra.mxu1 %v341_v51  ;;  %v556_v59 = vsub.f32 %v554_v54, %v555_v56 }
  0x34   : > { %443 = vmatpush.msrb.mxu0 %v333_v25  ;;  %344 = vmatmul.f32.vlgmr.msra.gmra.mxu1 %v1201_v17  ;;  %v551_v60 = vand.u32 4294901760, %v550_v58 }
  0x35   : > { %503 = vmatpush.msrb.mxu2 %v502_v48  ;;  %470 = vmatpush.msrb.mxu1 %v1174_v3  ;;  %v557_v61 = vand.u32 4294901760, %v556_v59 }
  0x36   : > { %447 = vmatpush.msrb.mxu0 %v339_v27  ;;  %416 = vmatmul.f32.gmra.mxu3 %v1247_v44 }
  0x37   : > { %383 = vmatmul.f32.gmra.mxu2 %v1235_v35  ;;  %472 = vmatpush.msrb.mxu1 %v1176_v4 }
  0x38   : > { %303 = vmatmul.f32.gmra.mxu0 %v302_v57  ;;  %552 = vmatpush.msrb.mxu3 %v551_v60 }
  0x39   : > { %505 = vmatpush.msrb.mxu2 %v504_v49  ;;  %474 = vmatpush.msrb.mxu1 %v1178_v5 }
  0x3a   : > { %558 = vmatpush.msrb.mxu3 %v557_v61  ;;  %582 = vmatpush.msra.mxu0 %v1207_v19 }
  0x3b   : > { %651 = vmatpush.msra.mxu2 %v537_v26  ;;  %476 = vmatpush.msrb.mxu1 %v1185_v9 }
  0x3c   : > { %686 = vmatpush.msra.mxu3 %v1188_v11  ;;  %348 = vmatmul.f32.gmra.mxu1 %v1220_v28 }
  0x3d   : > { %655 = vmatpush.msra.mxu2 %v543_v36  ;;  %616 = vmatpush.msra.mxu1 %v1188_v11 }
  0x3e   : > { %585 = vmatpush.msra.mxu0 %v1223_v29  ;;  %560 = vmatmul.f32.vlgmr.msrb.gmra.mxu3 %v1201_v17 }
  0x3f   : > { %511 = vmatmul.f32.vlgmr.msrb.gmra.mxu2 %v294_v46  ;;  %688 = vmatpush.msra.mxu3 %v1209_v20 }
  0x40   : > { %449 = vmatmul.f32.vlgmr.msrb.gmra.mxu0 %v1201_v17  ;;  %618 = vmatpush.msra.mxu1 %v1209_v20 }
  0x41   : > { %659 = vmatpush.msra.mxu2 %v549_v55  ;;  %588 = vmatpush.msra.mxu0 %v548_v53 }
  0x42   : > { %690 = vmatpush.msra.mxu3 %v502_v48  ;;  %620 = vmatpush.msra.mxu1 %v502_v48 }
  0x43   : > { %663 = vmatpush.msra.mxu2 %v555_v56  ;;  %591 = vmatpush.msra.mxu0 %v554_v54 }
  0x44   : > { %692 = vmatpush.msra.mxu3 %v504_v49  ;;  %478 = vmatmul.f32.vlgmr.msrb.gmra.mxu1 %v1201_v17 }
  0x45   : > { %622 = vmatpush.msra.mxu1 %v504_v49  ;;  %726 = vperm.xlu0 %947, %v718_v0  }
  0x46   : > { %564 = vmatmul.f32.gmra.mxu3 %v1220_v28 }
  0x47   : > { %519 = vmatmul.f32.gmra.mxu2 %v302_v57 }
  0x48   : > { %453 = vmatmul.f32.gmra.mxu0 %v1220_v28 }
  0x4c   : > { %482 = vmatmul.f32.gmra.mxu1 %v1220_v28 }
  0x4e   : > { %694 = vmatmul.f32.vlgmr.msra.gmra.mxu3 %v1201_v17 }
  0x4f   : > { %665 = vmatmul.f32.vlgmr.msra.gmra.mxu2 %v1201_v17 }
  0x50   : > { %594 = vmatmul.f32.vlgmr.msra.gmra.mxu0 %v1214_v23 }
  0x54   : > { %626 = vmatmul.f32.vlgmr.msra.gmra.mxu1 %v1227_v31 }
  0x56   : > { %698 = vmatmul.f32.gmra.mxu3 %v1220_v28 }
  0x57   : > { %669 = vmatmul.f32.gmra.mxu2 %v1220_v28 }
  0x58   : > { %599 = vmatmul.f32.gmra.mxu0 %v1235_v35 }
  0x5c   : > { %632 = vmatmul.f32.gmra.mxu1 %v1247_v44 }
  0x98   : > { %v722_v14 = vpop.permute.xlu0 %721 }
  0xad   : > { %v296_v1 = vpop.f32.mrf.mxu0 }
  0xb1   : > { %v345_v2 = vpop.f32.mrf.mxu1  ;;  %v411_v4 = vpop.f32.mrf.mxu3 }
  0xb2   : > { %v379_v3 = vpop.f32.mrf.mxu2  ;;  %v346_v6 = vadd.f32 %v345_v2, %v296_v1 }
  0xb4   : > { %v380_v9 = vadd.f32 %v379_v3, %v346_v6 }
  0xb5   : > { %v304_v5 = vpop.f32.mrf.mxu0 }
  0xb6   : > { %v412_v12 = vadd.f32 %v411_v4, %v380_v9 }
  0xb7   : > { %v727_v25 = vpop.permute.xlu0 %726 }
  0xb9   : > { %v349_v7 = vpop.f32.mrf.mxu1  ;;  %v417_v10 = vpop.f32.mrf.mxu3 }
  0xba   : > { %v384_v8 = vpop.f32.mrf.mxu2  ;;  %v350_v13 = vadd.f32 %v349_v7, %v304_v5 }
  0xbc   : > { %v385_v18 = vadd.f32 %v384_v8, %v350_v13 }
  0xbd   : > { %v450_v11 = vpop.f32.mrf.mxu0 }
  0xbe   : > { %v451_v15 = vadd.f32 %v450_v11, %v412_v12  ;;  %v418_v23 = vadd.f32 %v417_v10, %v385_v18 }
  0xc1   : > { %v479_v16 = vpop.f32.mrf.mxu1  ;;  %v561_v20 = vpop.f32.mrf.mxu3 }
  0xc2   : > { %v512_v17 = vpop.f32.mrf.mxu2  ;;  %v480_v19 = vadd.f32 %v479_v16, %v451_v15 }
  0xc3   : > { %v562_v32 = vadd.f32 %v561_v20, %v512_v17 }
  0xc4   : > { %v729_v21 = vadd.f32 %v722_v14, %v480_v19 }
  0xc5   : > { %v454_v22 = vpop.f32.mrf.mxu0 }
  0xc6   : > { %733 = vst [vmem:[%s1294_s9] sm:$0xff] %v729_v21  ;;  %v455_v24 = vadd.f32 %v454_v22, %v418_v23 }
  0xc9   : > { %v483_v26 = vpop.f32.mrf.mxu1  ;;  %v565_v29 = vpop.f32.mrf.mxu3 }
  0xca   : > { %v520_v27 = vpop.f32.mrf.mxu2  ;;  %v484_v28 = vadd.f32 %v483_v26, %v455_v24 }
  0xcb   : > { %v566_v40 = vadd.f32 %v565_v29, %v520_v27 }
  0xcc   : > { %v731_v30 = vadd.f32 %v727_v25, %v484_v28 }
  0xcd   : > { %v595_v31 = vpop.f32.mrf.mxu0 }
  0xce   : > { %735 = vst [vmem:[%s1294_s9 + $0x10] sm:$0xff] %v731_v30  ;;  %v596_v33 = vadd.f32 %v595_v31, %v562_v32 }
  0xd1   : > { %v627_v34 = vpop.f32.mrf.mxu1  ;;  %v695_v37 = vpop.f32.mrf.mxu3 }
  0xd2   : > { %v666_v35 = vpop.f32.mrf.mxu2  ;;  %v628_v36 = vadd.f32 %v627_v34, %v596_v33 }
  0xd4   : > { %v667_v38 = vadd.f32 %v666_v35, %v628_v36 }
  0xd5   : > { %v600_v39 = vpop.f32.mrf.mxu0 }
  0xd6   : > { %v696_v41 = vadd.f32 %v695_v37, %v667_v38  ;;  %v601_v42 = vadd.f32 %v600_v39, %v566_v40 }
  0xd8   : > { %v730_v43 = vadd.f32 %v722_v14, %v696_v41 }
  0xd9   : > { %v633_v44 = vpop.f32.mrf.mxu1  ;;  %v699_v47 = vpop.f32.mrf.mxu3 }
  0xda   : > { %v670_v45 = vpop.f32.mrf.mxu2  ;;  %734 = vst [vmem:[%s1294_s9 + $0x8] sm:$0xff] %v730_v43  ;;  %v634_v46 = vadd.f32 %v633_v44, %v601_v42 }
  0xdc   : > { %v671_v48 = vadd.f32 %v670_v45, %v634_v46 }
  0xde   : > { %v700_v49 = vadd.f32 %v699_v47, %v671_v48 }
  0xe0   : > { %v732_v50 = vadd.f32 %v727_v25, %v700_v49 }
  0xe2   : > { %736 = vst [vmem:[%s1294_s9 + $0x18] sm:$0xff] %v732_v50 }
  0xe3   : > { %1005 = shalt.err (!%p1002_p13)
}
  0xe4   : > { %s1065_s19 = smov 256   ;;  %s1066_s7 = smov 16  }
  0xe5   : > { %882 = dma.vmem_to_hbm [thread:$0]  (%p1138_p9), %s753_s23, 512, %s755_s29, %s738_s15, %s1065_s19, %s1065_s19, %s1066_s7  }
  0xe6 PF: > { %s769_s8 = sand.u32 1, %s1040_s12   ;;  %p889_p0 = pnand %p866_p12, %p1145_p11 }
  0xe7   : > { %s770_s9 = scalar_lea.sflag [#allocation5], %s769_s8 }
  0xe8   : > { %p890_p1 = pneg %p889_p0 }
  0xea   : > { %1035 = dma.done.wait (%p890_p1), %s770_s9, 512  }
  0xeb   : > { %1037 = vsyncadd (%p890_p1), %s770_s9, 4294966784  ;;  %s19_s17 = sadd.s32 1, %s1060_s17   ;;  %s1347_s12 = smov %s1044_s13 }
  0xec   : > { %p16_p2 = scmp.ge.s32.totalorder %s19_s17, 4   ;;  %s1348_s13 = smov %s1048_s14 }
  0xed   : > { %s1349_s14 = smov %s1143_s26  ;;  %s1350_s15 = smov %s1056_s16 }
  0xee   : > { %s1351_s16 = smov %s1353_s20  ;;  %18 = sbr.rel (!%p16_p2) target bundleno = 6 (0x6), region = 88 }
  0xf3   :  { %776 = vsyncpa [#allocation4], 1 }
  0xf4   :  { %778 = vsyncpa [#allocation4 + $0x1], 1 }
  0xf5   :  { %779 = vsyncpa [#allocation5], 1 }
  0xf6   :  { %781 = vsyncpa [#allocation5 + $0x1], 1 }

</bundles_post_ra>
